<compile_context>
chip_gen: v7x
topology: tpu7x:2x2x1
jax: 0.10.0
libtpu: 0.0.40
codegen_flags: <defaults>
</compile_context>

<pallas_src>
import functools
import math

import jax
import jax.numpy as jnp
from jax.experimental import pallas as pl
from jax.experimental.pallas import tpu as pltpu


def _round_up(n, m):
    return ((n + m - 1) // m) * m


# --------------------------------------------------------------------------
# Kernel
# --------------------------------------------------------------------------
def _fusion_kernel(x_ref, ctx_ref, t_ref,
                   wx_ref, wc_ref, wt_ref, b_ref,
                   out_ref, *, dim_out_p):
    # One wide fused projection per input stream; f32 accumulation on the MXU.
    z = jnp.dot(x_ref[...], wx_ref[...], preferred_element_type=jnp.float32)
    z = z + jnp.dot(ctx_ref[...], wc_ref[...], preferred_element_type=jnp.float32)
    z = z + jnp.dot(t_ref[...], wt_ref[...], preferred_element_type=jnp.float32)
    z = z + b_ref[...].astype(jnp.float32)          # (tm, 4*dim_out_p)

    # 128-aligned lane-group slices of the fused result.
    h1 = z[:, 0 * dim_out_p:1 * dim_out_p]           # layer1(x)
    h2 = z[:, 1 * dim_out_p:2 * dim_out_p]           # layer2(ctx)
    g1 = jax.nn.sigmoid(z[:, 2 * dim_out_p:3 * dim_out_p])   # gate1(in1)
    g2 = jax.nn.sigmoid(z[:, 3 * dim_out_p:4 * dim_out_p])   # gate2(in1)

    out_ref[...] = (h1 * g1 + h2 * g2).astype(out_ref.dtype)


# --------------------------------------------------------------------------
# Parameter construction / fusion (done once, outside the hot path)
# --------------------------------------------------------------------------
def init_params(key, dim_in, dim_out, dim_ctx, dim_time=3):
    """Deterministic synthetic init.  Weights stored as (in, out), PyTorch-style
    uniform(-1/sqrt(fan_in), 1/sqrt(fan_in)).  Gate weights' row order matches
    torch.cat((x, ctx, timeemb)): [x ; ctx ; timeemb]."""
    dim_tot = dim_in + dim_ctx + dim_time
    ks = jax.random.split(key, 8)

    def u(k, shape, fan):
        s = 1.0 / math.sqrt(float(fan))
        return jax.random.uniform(k, shape, jnp.float32, -s, s)

    return {
        "w1":  u(ks[0], (dim_in, dim_out), dim_in),
        "b1":  u(ks[1], (1, dim_out), dim_in),
        "w2":  u(ks[2], (dim_ctx, dim_out), dim_ctx),
        "b2":  u(ks[3], (1, dim_out), dim_ctx),
        "wg1": u(ks[4], (dim_tot, dim_out), dim_tot),
        "bg1": u(ks[5], (1, dim_out), dim_tot),
        "wg2": u(ks[6], (dim_tot, dim_out), dim_tot),
        "bg2": u(ks[7], (1, dim_out), dim_tot),
    }


def fuse_params(p, dim_in, dim_out, dim_ctx, dim_time):
    """Pre-concatenate the four Linear layers into per-input-stream weight slabs,
    padding dim_out up to a multiple of 128 for lane-dense layout."""
    dim_out_p = _round_up(dim_out, 128)

    def padw(w):  # pad output columns to dim_out_p
        return jnp.pad(w, ((0, 0), (0, dim_out_p - dim_out)))

    wg1, wg2 = p["wg1"], p["wg2"]
    wg1_x, wg1_c, wg1_t = wg1[:dim_in], wg1[dim_in:dim_in + dim_ctx], wg1[dim_in + dim_ctx:]
    wg2_x, wg2_c, wg2_t = wg2[:dim_in], wg2[dim_in:dim_in + dim_ctx], wg2[dim_in + dim_ctx:]

    zx = jnp.zeros((dim_in, dim_out_p), jnp.float32)
    zc = jnp.zeros((dim_ctx, dim_out_p), jnp.float32)
    zt = jnp.zeros((dim_time, dim_out_p), jnp.float32)

    wx = jnp.concatenate([padw(p["w1"]), zx, padw(wg1_x), padw(wg2_x)], axis=1)
    wc = jnp.concatenate([zc, padw(p["w2"]), padw(wg1_c), padw(wg2_c)], axis=1)
    wt = jnp.concatenate([zt, zt, padw(wg1_t), padw(wg2_t)], axis=1)
    b = jnp.concatenate([padw(p["b1"]), padw(p["b2"]),
                         padw(p["bg1"]), padw(p["bg2"])], axis=1)

    return {"wx": wx, "wc": wc, "wt": wt, "b": b, "dim_out": dim_out}


# --------------------------------------------------------------------------
# Wrapper
# --------------------------------------------------------------------------
def adaptive_fusion(ctx, x, timeemb, fused, *, tm=512, compute_dtype=jnp.float32):
    """ctx: [..., dim_ctx], x: [..., dim_in], timeemb: [..., dim_time]."""
    assert ctx.shape[:-1] == x.shape[:-1] == timeemb.shape[:-1]
    lead = x.shape[:-1]
    dim_in, dim_ctx, dim_time = x.shape[-1], ctx.shape[-1], timeemb.shape[-1]
    dim_out = fused["dim_out"]
    dim_out_p = fused["wx"].shape[-1] // 4

    N = math.prod(lead) if lead else 1

    # Row tile: multiple of 8 sublanes, no bigger than needed, capped at tm.
    tm_eff = max(8, min(_round_up(tm, 8), _round_up(max(N, 1), 8)))
    n_pad = _round_up(N, tm_eff)
    grid = (n_pad // tm_eff,)

    def flat(a, d):
        a = a.reshape(N, d)
        if n_pad != N:
            a = jnp.pad(a, ((0, n_pad - N), (0, 0)))
        return a.astype(compute_dtype)

    x2 = flat(x, dim_in)
    c2 = flat(ctx, dim_ctx)
    t2 = flat(timeemb, dim_time)

    wx = fused["wx"].astype(compute_dtype)
    wc = fused["wc"].astype(compute_dtype)
    wt = fused["wt"].astype(compute_dtype)
    b = fused["b"]  # stays f32; added after the f32 accumulation

    kernel = functools.partial(_fusion_kernel, dim_out_p=dim_out_p)

    out = pl.pallas_call(
        kernel,
        out_shape=jax.ShapeDtypeStruct((n_pad, dim_out_p), jnp.float32),
        grid_spec=pltpu.PrefetchScalarGridSpec(
            num_scalar_prefetch=0,
            grid=grid,
            in_specs=[
                pl.BlockSpec((tm_eff, dim_in), lambda i: (i, 0)),      # x rows
                pl.BlockSpec((tm_eff, dim_ctx), lambda i: (i, 0)),     # ctx rows
                pl.BlockSpec((tm_eff, dim_time), lambda i: (i, 0)),    # time rows
                pl.BlockSpec((dim_in, 4 * dim_out_p), lambda i: (0, 0)),    # Wx
                pl.BlockSpec((dim_ctx, 4 * dim_out_p), lambda i: (0, 0)),   # Wc
                pl.BlockSpec((dim_time, 4 * dim_out_p), lambda i: (0, 0)),  # Wt
                pl.BlockSpec((1, 4 * dim_out_p), lambda i: (0, 0)),         # bias
            ],
            out_specs=pl.BlockSpec((tm_eff, dim_out_p), lambda i: (i, 0)),
        ),
        compiler_params=pltpu.CompilerParams(
            # No cross-step state -> row grid can be sharded across TCs (v7x).
            dimension_semantics=("parallel",),
            # Raise scoped VMEM limit so large row tiles fit (safe on v5e-v7x).
            vmem_limit_bytes=48 * 1024 * 1024),
    )(x2, c2, t2, wx, wc, wt, b)

    return out[:N, :dim_out].reshape(*lead, dim_out)


# --------------------------------------------------------------------------
# Pure-JAX reference (mirrors the PyTorch forward exactly)
# --------------------------------------------------------------------------
def _reference(ctx, x, timeemb, p):
    in1 = jnp.concatenate([x, ctx, timeemb], axis=-1)
    g1 = jax.nn.sigmoid(in1 @ p["wg1"] + p["bg1"][0])
    g2 = jax.nn.sigmoid(in1 @ p["wg2"] + p["bg2"][0])
    return (x @ p["w1"] + p["b1"][0]) * g1 + (ctx @ p["w2"] + p["b2"][0]) * g2


if __name__ == "__main__":
    batch, seq = 2, 8
    dim_in, dim_out, dim_ctx, dim_time = 32, 32, 16, 3

    key = jax.random.PRNGKey(0)
    k_ctx, k_x, k_t, k_p = jax.random.split(key, 4)

    ctx = jax.random.normal(k_ctx, (batch, seq, dim_ctx), jnp.float32)
    x = jax.random.normal(k_x, (batch, seq, dim_in), jnp.float32)
    timeemb = jax.random.normal(k_t, (batch, seq, dim_time), jnp.float32)

    params = init_params(k_p, dim_in, dim_out, dim_ctx, dim_time)
    fused = fuse_params(params, dim_in, dim_out, dim_ctx, dim_time)

    # f32 path: exact check against the reference forward.
    out = adaptive_fusion(ctx, x, timeemb, fused)
    jax.block_until_ready(out)

    ref = _reference(ctx, x, timeemb, params)
    assert out.shape == (batch, seq, dim_out)
    assert jnp.allclose(out, ref, atol=1e-4, rtol=1e-4)

    # bf16 MXU-operand path (production setting on v6e/v7x): smoke test only.
    out_bf16 = adaptive_fusion(ctx, x, timeemb, fused, compute_dtype=jnp.bfloat16)
    jax.block_until_ready(out_bf16)
    assert out_bf16.shape == (batch, seq, dim_out)
    assert bool(jnp.all(jnp.isfinite(out_bf16)))

    print("KERNEL_OK")
</pallas_src>

<mosaic_0001>
module attributes {stable_mosaic.version = 11 : i64} {
  func.func @_fusion_kernel(%arg0: i32, %arg1: memref<16x32xf32, #tpu.memory_space<vmem>>, %arg2: memref<16x16xf32, #tpu.memory_space<vmem>>, %arg3: memref<16x3xf32, #tpu.memory_space<vmem>>, %arg4: memref<32x512xf32, #tpu.memory_space<vmem>>, %arg5: memref<16x512xf32, #tpu.memory_space<vmem>>, %arg6: memref<3x512xf32, #tpu.memory_space<vmem>>, %arg7: memref<1x512xf32, #tpu.memory_space<vmem>>, %arg8: memref<16x128xf32, #tpu.memory_space<vmem>>) attributes {dimension_semantics = [#tpu.dimension_semantics<parallel>], iteration_bounds = array<i64: 1>, scalar_prefetch = 0 : i64, scratch_operands = 0 : i64, tpu.core_type = #tpu.core_type<tc>, window_params = [{transform_indices = @transform_0, window_bounds = array<i64: 16, 32>}, {transform_indices = @transform_1, window_bounds = array<i64: 16, 16>}, {transform_indices = @transform_2, window_bounds = array<i64: 16, 3>}, {pipeline_mode = #tpu.pipeline_mode<synchronous>, transform_indices = @transform_3, window_bounds = array<i64: 32, 512>}, {pipeline_mode = #tpu.pipeline_mode<synchronous>, transform_indices = @transform_4, window_bounds = array<i64: 16, 512>}, {pipeline_mode = #tpu.pipeline_mode<synchronous>, transform_indices = @transform_5, window_bounds = array<i64: 3, 512>}, {pipeline_mode = #tpu.pipeline_mode<synchronous>, transform_indices = @transform_6, window_bounds = array<i64: 1, 512>}, {transform_indices = @transform_7, window_bounds = array<i64: 16, 128>}]} {
    %c0 = arith.constant 0 : index
    %c0_0 = arith.constant 0 : index
    %0 = vector.load %arg1[%c0, %c0_0] : memref<16x32xf32, #tpu.memory_space<vmem>>, vector<16x32xf32>
    %c0_1 = arith.constant 0 : index
    %c0_2 = arith.constant 0 : index
    %1 = vector.load %arg4[%c0_1, %c0_2] : memref<32x512xf32, #tpu.memory_space<vmem>>, vector<32x512xf32>
    %cst = arith.constant dense<0.000000e+00> : vector<16x512xf32>
    %2 = tpu.matmul %0, %1, %cst {dimension_numbers = #tpu.dot_dimension_numbers<[1], [0], [0], [1], [0, 0, 1, 1], [], []>} : vector<16x32xf32>, vector<32x512xf32>, vector<16x512xf32> -> vector<16x512xf32>
    %c0_3 = arith.constant 0 : index
    %c0_4 = arith.constant 0 : index
    %3 = vector.load %arg2[%c0_3, %c0_4] : memref<16x16xf32, #tpu.memory_space<vmem>>, vector<16x16xf32>
    %c0_5 = arith.constant 0 : index
    %c0_6 = arith.constant 0 : index
    %4 = vector.load %arg5[%c0_5, %c0_6] : memref<16x512xf32, #tpu.memory_space<vmem>>, vector<16x512xf32>
    %cst_7 = arith.constant dense<0.000000e+00> : vector<16x512xf32>
    %5 = tpu.matmul %3, %4, %cst_7 {dimension_numbers = #tpu.dot_dimension_numbers<[1], [0], [0], [1], [0, 0, 1, 1], [], []>} : vector<16x16xf32>, vector<16x512xf32>, vector<16x512xf32> -> vector<16x512xf32>
    %6 = arith.addf %2, %5 : vector<16x512xf32>
    %c0_8 = arith.constant 0 : index
    %c0_9 = arith.constant 0 : index
    %7 = vector.load %arg3[%c0_8, %c0_9] : memref<16x3xf32, #tpu.memory_space<vmem>>, vector<16x3xf32>
    %c0_10 = arith.constant 0 : index
    %c0_11 = arith.constant 0 : index
    %8 = vector.load %arg6[%c0_10, %c0_11] : memref<3x512xf32, #tpu.memory_space<vmem>>, vector<3x512xf32>
    %cst_12 = arith.constant dense<0.000000e+00> : vector<16x512xf32>
    %9 = tpu.matmul %7, %8, %cst_12 {dimension_numbers = #tpu.dot_dimension_numbers<[1], [0], [0], [1], [0, 0, 1, 1], [], []>} : vector<16x3xf32>, vector<3x512xf32>, vector<16x512xf32> -> vector<16x512xf32>
    %10 = arith.addf %6, %9 : vector<16x512xf32>
    %c0_13 = arith.constant 0 : index
    %c0_14 = arith.constant 0 : index
    %11 = vector.load %arg7[%c0_13, %c0_14] : memref<1x512xf32, #tpu.memory_space<vmem>>, vector<1x512xf32>
    %12 = vector.broadcast %11 : vector<1x512xf32> to vector<16x512xf32>
    %13 = arith.addf %10, %12 : vector<16x512xf32>
    %14 = vector.extract_strided_slice %13 {offsets = [0, 0], sizes = [16, 128], strides = [1, 1]} : vector<16x512xf32> to vector<16x128xf32>
    %15 = vector.extract_strided_slice %13 {offsets = [0, 128], sizes = [16, 128], strides = [1, 1]} : vector<16x512xf32> to vector<16x128xf32>
    %16 = vector.extract_strided_slice %13 {offsets = [0, 256], sizes = [16, 128], strides = [1, 1]} : vector<16x512xf32> to vector<16x128xf32>
    %17 = arith.negf %16 : vector<16x128xf32>
    %18 = math.exp %17 : vector<16x128xf32>
    %cst_15 = arith.constant 1.000000e+00 : f32
    %19 = vector.broadcast %cst_15 : f32 to vector<16x128xf32>
    %20 = arith.addf %19, %18 : vector<16x128xf32>
    %21 = arith.divf %19, %20 : vector<16x128xf32>
    %22 = vector.extract_strided_slice %13 {offsets = [0, 384], sizes = [16, 128], strides = [1, 1]} : vector<16x512xf32> to vector<16x128xf32>
    %23 = arith.negf %22 : vector<16x128xf32>
    %24 = math.exp %23 : vector<16x128xf32>
    %cst_16 = arith.constant 1.000000e+00 : f32
    %25 = vector.broadcast %cst_16 : f32 to vector<16x128xf32>
    %26 = arith.addf %25, %24 : vector<16x128xf32>
    %27 = arith.divf %25, %26 : vector<16x128xf32>
    %28 = arith.mulf %14, %21 : vector<16x128xf32>
    %29 = arith.mulf %15, %27 : vector<16x128xf32>
    %30 = arith.addf %28, %29 : vector<16x128xf32>
    %c0_17 = arith.constant 0 : index
    %c0_18 = arith.constant 0 : index
    %31 = vector.load %arg8[%c0_17, %c0_18] : memref<16x128xf32, #tpu.memory_space<vmem>>, vector<16x128xf32>
    tpu.vector_store %arg8[%c0_17, %c0_18], %30 {strides = array<i32>} : memref<16x128xf32, #tpu.memory_space<vmem>>, vector<16x128xf32>,
    return
  }
  func.func @transform_0(%arg0: i32) -> (i32, i32) {
    %c0_i32 = arith.constant 0 : i32
    %c0_i32_0 = arith.constant 0 : i32
    return %arg0, %c0_i32 : i32, i32
  }
  func.func @transform_1(%arg0: i32) -> (i32, i32) {
    %c0_i32 = arith.constant 0 : i32
    %c0_i32_0 = arith.constant 0 : i32
    return %arg0, %c0_i32 : i32, i32
  }
  func.func @transform_2(%arg0: i32) -> (i32, i32) {
    %c0_i32 = arith.constant 0 : i32
    %c0_i32_0 = arith.constant 0 : i32
    return %arg0, %c0_i32 : i32, i32
  }
  func.func @transform_3(%arg0: i32) -> (i32, i32) {
    %c0_i32 = arith.constant 0 : i32
    %c0_i32_0 = arith.constant 0 : i32
    %c0_i32_1 = arith.constant 0 : i32
    return %c0_i32, %c0_i32_0 : i32, i32
  }
  func.func @transform_4(%arg0: i32) -> (i32, i32) {
    %c0_i32 = arith.constant 0 : i32
    %c0_i32_0 = arith.constant 0 : i32
    %c0_i32_1 = arith.constant 0 : i32
    return %c0_i32, %c0_i32_0 : i32, i32
  }
  func.func @transform_5(%arg0: i32) -> (i32, i32) {
    %c0_i32 = arith.constant 0 : i32
    %c0_i32_0 = arith.constant 0 : i32
    %c0_i32_1 = arith.constant 0 : i32
    return %c0_i32, %c0_i32_0 : i32, i32
  }
  func.func @transform_6(%arg0: i32) -> (i32, i32) {
    %c0_i32 = arith.constant 0 : i32
    %c0_i32_0 = arith.constant 0 : i32
    %c0_i32_1 = arith.constant 0 : i32
    return %c0_i32, %c0_i32_0 : i32, i32
  }
  func.func @transform_7(%arg0: i32) -> (i32, i32) {
    %c0_i32 = arith.constant 0 : i32
    %c0_i32_0 = arith.constant 0 : i32
    return %arg0, %c0_i32 : i32, i32
  }
}

</mosaic_0001>

<bundles_post_ra>
// kernel: tpu_custom_call.1
= control target key start
LH: loop header
LB: loop body
LE: loop exit
PB: predicated region body
PF: predicated region fallthrough
CT: control target
= control target key end

     0   :  { %12 = vsyncpa [#allocation3], 0  ;;  %s1019_s0 = inlined_call_operand.vmem [shape: f32[16,32], index: 0, kind: input, shape index: {}]   ;;  %s1020_s1 = inlined_call_operand.hbm [shape: f32[16,16], index: 1, kind: input, shape index: {}]   ;;  %s1021_s2 = inlined_call_operand.vmem [shape: f32[16,3], index: 2, kind: input, shape index: {}]   ;;  %s1022_s3 = inlined_call_operand.hbm [shape: f32[32,512], index: 3, kind: input, shape index: {}]   ;;  %s1023_s4 = inlined_call_operand.hbm [shape: f32[16,512], index: 4, kind: input, shape index: {}]   ;;  %s1024_s5 = inlined_call_operand.vmem [shape: f32[3,512], index: 5, kind: input, shape index: {}]   ;;  %s1025_s6 = inlined_call_operand.vmem [shape: f32[1,512], index: 6, kind: input, shape index: {}]   ;;  %s1026_s7 = inlined_call_operand.hbm [shape: f32[16,128], index: 7, kind: output, shape index: {}]  }
   0x1   :  { %13 = vsyncpa [#allocation6], 0 }
   0x2   :  { %14 = vsyncpa [#allocation4], 0  ;;  %s865_s24 = smov [#allocation5]   ;;  %s771_s28 = scalar_lea.hbm %s1022_s3, 2048 }
   0x3   :  { %s36_s25 = sshll.u32 %s865_s24, 4  ;;  %p772_p0 = scmp.ne.s32.totalorder %s1022_s3, %s771_s28  ;;  %s37_s25 = int_to_ptr.vmem [resolvable:$true] %s36_s25 }
   0x4   :  { %p775_p1 = scmp.lt.u32.totalorder %s771_s28, %s1022_s3 }
   0x6   :  { %p777_p2 = pnand %p775_p1, %p772_p0 }
   0x8   :  { %780 = shalt.err (!%p777_p2)
}
   0x9   :  { %s781_s10 = scalar_lea.vmem %s37_s25, 2048  ;;  %p786_p4 = scmp.lt.s32.totalorder %s37_s25, %s37_s25 }
   0xa   :  { %p782_p3 = scmp.ne.s32.totalorder %s37_s25, %s781_s10  ;;  %p787_p5 = scmp.lt.s32.totalorder %s781_s10, %s781_s10 }
   0xc   :  { %p788_p6 = por %p787_p5, %p786_p4 }
   0xe   :  { %p789_p7 = pnand %p788_p6, %p782_p3 }
  0x10   :  { %792 = shalt.err (!%p789_p7)
}
  0x11   :  { %s866_s11 = smov 512   ;;  %s867_s12 = smov 32  }
  0x12   :  { %42 = dma.hbm_to_vmem [thread:$0]  %s1022_s3, 2048, %s37_s25, [#allocation6], %s866_s11, %s866_s11, %s867_s12  }
  0x13   :  { %s868_s15 = smov [#allocation2]   ;;  %s793_s19 = scalar_lea.hbm %s1020_s1, 256 }
  0x14   :  { %s22_s16 = sshll.u32 %s868_s15, 4  ;;  %p794_p8 = scmp.ne.s32.totalorder %s1020_s1, %s793_s19  ;;  %s23_s16 = int_to_ptr.vmem [resolvable:$true] %s22_s16 }
  0x15   :  { %p797_p9 = scmp.lt.u32.totalorder %s793_s19, %s1020_s1 }
  0x17   :  { %p799_p10 = pnand %p797_p9, %p794_p8 }
  0x19   :  { %802 = shalt.err (!%p799_p10)
}
  0x1a   :  { %s803_s24 = scalar_lea.vmem %s23_s16, 256  ;;  %p808_p12 = scmp.lt.s32.totalorder %s23_s16, %s23_s16 }
  0x1b   :  { %p804_p11 = scmp.ne.s32.totalorder %s23_s16, %s803_s24  ;;  %p809_p13 = scmp.lt.s32.totalorder %s803_s24, %s803_s24 }
  0x1d   :  { %p810_p0 = por %p809_p13, %p808_p12 }
  0x1f   :  { %p811_p1 = pnand %p810_p0, %p804_p11 }
  0x21   :  { %814 = shalt.err (!%p811_p1)
}
  0x22   :  { %s869_s3 = smov 128   ;;  %s870_s25 = smov 8  }
  0x23   :  { %28 = dma.hbm_to_vmem [thread:$0]  %s1020_s1, 256, %s23_s16, [#allocation3], %s869_s3, %s869_s3, %s870_s25  }
  0x24   :  { %s871_s28 = smov [#allocation7]   ;;  %s815_s9 = scalar_lea.hbm %s1023_s4, 1024 }
  0x25   :  { %s48_s29 = sshll.u32 %s871_s28, 4  ;;  %p816_p2 = scmp.ne.s32.totalorder %s1023_s4, %s815_s9  ;;  %s49_s29 = int_to_ptr.vmem [resolvable:$true] %s48_s29 }
  0x26   :  { %p819_p3 = scmp.lt.u32.totalorder %s815_s9, %s1023_s4 }
  0x28   :  { %p821_p4 = pnand %p819_p3, %p816_p2 }
  0x2a   :  { %824 = shalt.err (!%p821_p4)
}
  0x2b   :  { %s825_s17 = scalar_lea.vmem %s49_s29, 1024  ;;  %p830_p6 = scmp.lt.s32.totalorder %s49_s29, %s49_s29 }
  0x2c   :  { %p826_p5 = scmp.ne.s32.totalorder %s49_s29, %s825_s17  ;;  %p831_p7 = scmp.lt.s32.totalorder %s825_s17, %s825_s17 }
  0x2e   :  { %p832_p8 = por %p831_p7, %p830_p6 }
  0x30   :  { %p833_p9 = pnand %p832_p8, %p826_p5 }
  0x32   :  { %836 = shalt.err (!%p833_p9)
}
  0x33   :  { %54 = dma.hbm_to_vmem [thread:$0]  %s1023_s4, 1024, %s49_s29, [#allocation6], %s866_s11, %s866_s11, %s867_s12  }
  0x34   :  { %859 = dma.done.wait [#allocation3], 256  }
  0x35   :  { %860 = vsyncadd [#allocation3], 4294967040 }
  0x36   :  { %861 = dma.done.wait [#allocation6], 3072  }
  0x37   :  { %862 = vsyncadd [#allocation6], 4294964224  ;;  %v872_v0 = vmov 0.0   ;;  %v91_v1 = vld [vmem:[#allocation7 + $0x18] sm:$0xff]  ;;  %v90_v3 = vld [vmem:[#allocation7 + $0x10] sm:$0xff]  ;;  %vm96_vm0 = vcmask 130048   ;;  %v606_v47 = vlaneseq }
  0x38   :  { %244 = vmatprep.mubr.f32.mxu1 %v872_v0  ;;  %167 = vmatprep.mubr.f32.mxu0 %v872_v0  ;;  %v95_v2 = vld [vmem:[#allocation7 + $0x38] sm:$0xff]  ;;  %v94_v5 = vld [vmem:[#allocation7 + $0x30] sm:$0xff]  ;;  %v89_v18 = vld [vmem:[#allocation7 + $0x8] sm:$0xff]  ;;  %vm433_vm1 = vcmask 1042432   ;;  %vm257_vm2 = vcmask 261120   ;;  %vm426_vm3 = vcmask 23552  }
  0x39   :  { %v708_v4 = vpack.c.bf16 %v95_v2, %v91_v1  ;;  %v73_v6 = vld [vmem:[#allocation5 + $0x18] sm:$0xff]  ;;  %v710_v7 = vpack.c.bf16 %v94_v5, %v90_v3  ;;  %v72_v9 = vld [vmem:[#allocation5 + $0x10] sm:$0xff]  ;;  %v93_v20 = vld [vmem:[#allocation7 + $0x28] sm:$0xff]  ;;  %v607_v48 = vshrl.u32 %v606_v47, 7 }
  0x3a   :  { %v77_v8 = vld [vmem:[#allocation5 + $0x38] sm:$0xff]  ;;  %v76_v10 = vld [vmem:[#allocation5 + $0x30] sm:$0xff]  ;;  %v88_v21 = vld [vmem:[#allocation7] sm:$0xff]  ;;  %v704_v23 = vpack.c.bf16 %v93_v20, %v89_v18 }
  0x3b   :  { %709 = vmatprep.subr.bf16.mxu1 %v708_v4  ;;  %v86_v11 = vld [vmem:[#allocation2] sm:$0xff]  ;;  %v720_v12 = vpack.c.bf16 %v77_v8, %v73_v6  ;;  %v81_v13 = vld [vmem:[#allocation5 + $0x58] sm:$0xff]  ;;  %v722_v15 = vpack.c.bf16 %v76_v10, %v72_v9  ;;  %v92_v22 = vld [vmem:[#allocation7 + $0x20] sm:$0xff]  ;;  %v616_v49 = vsub.s32 2, %v607_v48  ;;  %v620_v51 = vsub.s32 3, %v607_v48 }
  0x3c   :  { %v85_v14 = vld [vmem:[#allocation5 + $0x78] sm:$0xff]  ;;  %711 = vmatpush1.bf16.msra.mxu1 %v710_v7  ;;  %v80_v16 = vld [vmem:[#allocation5 + $0x50] sm:$0xff]  ;;  %v706_v24 = vpack.c.bf16 %v92_v22, %v88_v21  ;;  %v71_v26 = vld [vmem:[#allocation5 + $0x8] sm:$0xff]  ;;  %705 = vmatprep.subr.bf16.mxu0 %v704_v23 }
  0x3d   :  { %v84_v17 = vld [vmem:[#allocation5 + $0x70] sm:$0xff]  ;;  %721 = vmatprep.subr.bf16.mxu1 %v720_v12  ;;  %v724_v19 = vpack.c.bf16 %v85_v14, %v81_v13  ;;  %v421_v25 = vld [vmem:[%s1024_s5 + $0x8] sm:$0x77]  ;;  %v75_v27 = vld [vmem:[#allocation5 + $0x28] sm:$0xff]  ;;  %v612_v14 = vsub.s32 1, %v607_v48 }
  0x3e   :  { %v70_v28 = vld [vmem:[#allocation5] sm:$0xff]  ;;  %v87_v30 = vld [vmem:[#allocation2 + $0x8] sm:$0xff]  ;;  %v726_v31 = vpack.c.bf16 %v84_v17, %v80_v16  ;;  %v712_v32 = vpack.c.bf16 %v75_v27, %v71_v26  ;;  %v79_v33 = vld [vmem:[#allocation5 + $0x48] sm:$0xff]  ;;  %v425_v35 = vcombine.high %v421_v25, %v421_v25  ;;  %707 = vmatpush1.bf16.msra.mxu0 %v706_v24 }
  0x3f   :  { %686 = vmatmul.mubr.msk.f32.vlgmr.msra.gmra.mrb[0].mxu1 %vm96_vm0, %v86_v11  ;;  %v74_v29 = vld [vmem:[#allocation5 + $0x20] sm:$0xff]  ;;  %v83_v34 = vld [vmem:[#allocation5 + $0x68] sm:$0xff]  ;;  %v68_v40 = vld [vmem:[%s1019_s0] sm:$0xff] }
  0x40   :  { %723 = vmatpush1.bf16.msra.mxu1 %v722_v15  ;;  %250 = vmatprep.mubr.f32.mxu1 %v872_v0  ;;  %v714_v36 = vpack.c.bf16 %v74_v29, %v70_v28  ;;  %v716_v37 = vpack.c.bf16 %v83_v34, %v79_v33  ;;  %v78_v38 = vld [vmem:[#allocation5 + $0x40] sm:$0xff]  ;;  %v420_v41 = vld [vmem:[%s1024_s5] sm:$0x77]  ;;  %v69_v44 = vld [vmem:[%s1019_s0 + $0x8] sm:$0xff] }
  0x41   :  { %725 = vmatprep.subr.bf16.mxu1 %v724_v19  ;;  %713 = vmatprep.subr.bf16.mxu0 %v712_v32  ;;  %v82_v39 = vld [vmem:[#allocation5 + $0x60] sm:$0xff]  ;;  %v424_v43 = vcombine.high %v420_v41, %v420_v41  ;;  %v418_v45 = vld [vmem:[%s1021_s2] sm:$0xff]  ;;  %v419_v46 = vld [vmem:[%s1021_s2 + $0x8] sm:$0xff]  ;;  %s873_s2 = smov [#allocation8]  }
  0x42   :  { %684 = vmatmul.mubr.msk.f32.vlgmr.msra.gmra.mrb[0].mxu0 %vm96_vm0, %v86_v11  ;;  %v718_v42 = vpack.c.bf16 %v82_v39, %v78_v38  ;;  %v604_v50 = vld [vmem:[%s1025_s6] sm:$0xf]  ;;  %v608_v11 = vsub.s32 0, %v607_v48  ;;  %s671_s6 = sshll.u32 %s873_s2, 4  ;;  %s672_s6 = int_to_ptr.vmem [resolvable:$true] %s671_s6 }
  0x43   :  { %687 = vmatmul.mubr.msk.f32.gmra.mrb[2].mxu1 %vm96_vm0, %v87_v30  ;;  %715 = vmatpush1.bf16.msra.mxu0 %v714_v36  ;;  %v617_v52 = vrot.slane %v604_v50, %v616_v49  ;;  %v621_v53 = vrot.slane %v604_v50, %v620_v51  ;;  %v613_v17 = vrot.slane %v604_v50, %v612_v14  ;;  %s837_s28 = scalar_lea.vmem %s672_s6, 256  ;;  %p842_p11 = scmp.lt.s32.totalorder %s672_s6, %s672_s6 }
  0x44   :  { %727 = vmatpush1.bf16.msra.mxu1 %v726_v31  ;;  %405 = vmatprep.mubr.f32.mxu1 %v872_v0  ;;  %v609_v16 = vrot.slane %v604_v50, %v608_v11  ;;  %p838_p10 = scmp.ne.s32.totalorder %s672_s6, %s837_s28  ;;  %p843_p12 = scmp.lt.s32.totalorder %s837_s28, %s837_s28 }
  0x45   :  { %696 = vmatprep.subr.msk.mxu1 %vm433_vm1, %v425_v35  ;;  %173 = vmatprep.mubr.f32.mxu0 %v872_v0 }
  0x46   :  { %717 = vmatprep.subr.bf16.mxu0 %v716_v37  ;;  %685 = vmatmul.mubr.msk.f32.gmra.mrb[2].mxu0 %vm96_vm0, %v87_v30  ;;  %p844_p13 = por %p843_p12, %p842_p11 }
  0x47   :  { %690 = vmatmul.mubr.msk.f32.vlgmr.msra.gmra.mrb[0].mxu1 %vm257_vm2, %v68_v40  ;;  %719 = vmatpush1.bf16.msra.mxu0 %v718_v42 }
  0x48   :  { %697 = vmatpush1.msk.msra.mxu1 %vm433_vm1, %v421_v25  ;;  %411 = vmatprep.mubr.f32.mxu1 %v872_v0  ;;  %p845_p0 = pnand %p844_p13, %p838_p10 }
  0x49   :  { %328 = vmatprep.mubr.f32.mxu0 %v872_v0  ;;  %692 = vmatprep.subr.msk.mxu0 %vm433_vm1, %v424_v43 }
  0x4a   :  { %688 = vmatmul.mubr.msk.f32.vlgmr.msra.gmra.mrb[0].mxu0 %vm257_vm2, %v68_v40 }
  0x4b   :  { %691 = vmatmul.mubr.msk.f32.gmra.mrb[2].mxu1 %vm257_vm2, %v69_v44  ;;  %334 = vmatprep.mubr.f32.mxu0 %v872_v0 }
  0x4c   :  { %583 = vmatprep.mubr.f32.mxu1 %v872_v0  ;;  %693 = vmatpush1.msk.msra.mxu0 %vm433_vm1, %v420_v41 }
  0x4e   :  { %689 = vmatmul.mubr.msk.f32.gmra.mrb[2].mxu0 %vm257_vm2, %v69_v44 }
  0x4f   :  { %698 = vmatmul.mubr.msk.f32.vlgmr.msra.gmra.mrb[0].mxu1 %vm426_vm3, %v418_v45  ;;  %506 = vmatprep.mubr.f32.mxu0 %v872_v0 }
  0x50   :  { %589 = vmatprep.mubr.f32.mxu1 %v872_v0 }
  0x52   :  { %694 = vmatmul.mubr.msk.f32.vlgmr.msra.gmra.mrb[0].mxu0 %vm426_vm3, %v418_v45 }
  0x53   :  { %699 = vmatmul.mubr.msk.f32.gmra.mrb[2].mxu1 %vm426_vm3, %v419_v46  ;;  %512 = vmatprep.mubr.f32.mxu0 %v872_v0 }
  0x56   :  { %695 = vmatmul.mubr.msk.f32.gmra.mrb[2].mxu0 %vm426_vm3, %v419_v46 }
 0x122   :  { %v585_v54 = vpop.f32.mrb[0].mxu1 }
 0x123   :  { %v628_v55 = vadd.f32 %v617_v52, %v585_v54  ;;  %v587_v56 = vpop.f32.mrb[1].mxu1 }
 0x124   :  { %v629_v57 = vadd.f32 %v621_v53, %v587_v56 }
 0x125   :  { %v700_v58 = vmul.f32 -1.442695, %v628_v55  ;;  %v508_v0 = vpop.f32.mrb[0].mxu0 }
 0x126   :  { %v702_v59 = vmul.f32 -1.442695, %v629_v57  ;;  %v591_v60 = vpop.f32.mrb[2].mxu1  ;;  %v510_v2 = vpop.f32.mrb[1].mxu0  ;;  %v626_v18 = vadd.f32 %v609_v16, %v508_v0 }
 0x127   :  { %755 = vpow2.f32 %v700_v58  ;;  %v632_v61 = vadd.f32 %v617_v52, %v591_v60  ;;  %v593_v62 = vpop.f32.mrb[3].mxu1  ;;  %v627_v20 = vadd.f32 %v613_v17, %v510_v2 }
 0x128   :  { %757 = vpow2.f32 %v702_v59  ;;  %v633_v63 = vadd.f32 %v621_v53, %v593_v62 }
 0x129   :  { %v701_v1 = vmul.f32 -1.442695, %v632_v61  ;;  %v514_v4 = vpop.f32.mrb[2].mxu0 }
 0x12a   :  { %v703_v3 = vmul.f32 -1.442695, %v633_v63  ;;  %v516_v5 = vpop.f32.mrb[3].mxu0  ;;  %v630_v24 = vadd.f32 %v609_v16, %v514_v4 }
 0x12b   :  { %759 = vpow2.f32 %v701_v1  ;;  %v631_v27 = vadd.f32 %v613_v17, %v516_v5 }
 0x12c   :  { %761 = vpow2.f32 %v703_v3 }
 0x131   :  { %v756_v6 = vpop.eup %755 }
 0x132   :  { %v758_v7 = vpop.eup %757  ;;  %v640_v8 = vadd.f32 1.0, %v756_v6 }
 0x133   :  { %v652_v9 = vadd.f32 1.0, %v758_v7 }
 0x134   :  { %763 = vrcp.f32 %v640_v8 }
 0x135   :  { %v760_v10 = vpop.eup %759  ;;  %765 = vrcp.f32 %v652_v9 }
 0x136   :  { %v762_v12 = vpop.eup %761  ;;  %v641_v13 = vadd.f32 1.0, %v760_v10 }
 0x137   :  { %v653_v15 = vadd.f32 1.0, %v762_v12 }
 0x138   :  { %767 = vrcp.f32 %v641_v13 }
 0x139   :  { %769 = vrcp.f32 %v653_v15 }
 0x13e   :  { %v764_v19 = vpop.eup %763 }
 0x13f   :  { %v766_v21 = vpop.eup %765  ;;  %v658_v22 = vmul.f32 %v764_v19, %v626_v18 }
 0x140   :  { %v660_v23 = vmul.f32 %v766_v21, %v627_v20 }
 0x142   :  { %v768_v25 = vpop.eup %767  ;;  %v662_v26 = vadd.f32 %v660_v23, %v658_v22 }
 0x143   :  { %v770_v28 = vpop.eup %769  ;;  %v659_v29 = vmul.f32 %v768_v25, %v630_v24 }
 0x144   :  { %664 = vst [vmem:[#allocation8] sm:$0xff] %v662_v26  ;;  %v661_v30 = vmul.f32 %v770_v28, %v631_v27 }
 0x146   :  { %v663_v31 = vadd.f32 %v661_v30, %v659_v29 }
 0x148   :  { %665 = vst [vmem:[#allocation8 + $0x8] sm:$0xff] %v663_v31 }
 0x149   :  { %848 = shalt.err (!%p845_p0)
}
 0x14a   :  { %s849_s8 = scalar_lea.hbm %s1026_s7, 256 }
 0x14b   :  { %p850_p1 = scmp.ne.s32.totalorder %s1026_s7, %s849_s8  ;;  %p853_p2 = scmp.lt.u32.totalorder %s849_s8, %s1026_s7 }
 0x14d   :  { %p855_p3 = pnand %p853_p2, %p850_p1 }
 0x14f   :  { %858 = shalt.err (!%p855_p3)
}
 0x150   :  { %677 = dma.vmem_to_hbm [thread:$0]  %s672_s6, 256, %s1026_s7, [#allocation4], %s869_s3, %s869_s3, %s870_s25  }
 0x151   :  { %863 = dma.done.wait [#allocation4], 256  }
 0x152   :  { %864 = vsyncadd [#allocation4], 4294967040 }
 0x153   :  { %681 = vsyncpa [#allocation3], 1 }
 0x154   :  { %682 = vsyncpa [#allocation6], 1 }
 0x155   :  { %683 = vsyncpa [#allocation4], 1 }

</bundles_post_ra>
